<compile_context>
chip_gen: v7x
topology: tpu7x:2x2x1
jax: 0.10.0
libtpu: 0.0.40
codegen_flags: <defaults>
</compile_context>

<pallas_src>
import jax
import jax.numpy as jnp
from jax.experimental import pallas as pl
from jax.experimental.pallas import tpu as pltpu

VOCAB = 128      # vocab_sz
HID = 15         # dense1 output features
HID_PAD = 128    # lane-padded hidden
OUT = 1          # dense2 output features

TB = 128         # batch rows per grid step
BATCH = 256      # total batch rows (grid of 2 steps; pattern scales to 1000s)

L1_COEF = 1e-5
L2_COEF = 1e-4


def nbow_kernel(x_ref, w1_ref, b1_ref, w2_ref, b2_ref, out_ref):
    # Dropout(0.1) in eval/inference mode == identity.
    x = x_ref[...]                                    # (TB, V) bf16
    w1 = w1_ref[...]                                  # (V, HID_PAD) bf16, cols >= HID zero

    # dense1 on the MXU (bf16 inputs, f32 accumulate) + bias + ReLU.
    h = jnp.dot(x, w1, preferred_element_type=jnp.float32) + b1_ref[...]   # (TB, HID_PAD) f32
    h = jnp.maximum(h, 0.0)

    # dense2: OUT == 1, so w2 is a (1, HID_PAD) row -> broadcast-mul + lane
    # reduction (XLU) instead of a padded (128,128) matmul.  b2 is an SMEM scalar.
    logit = jnp.sum(h * w2_ref[...], axis=-1, keepdims=True) + b2_ref[0, 0]  # (TB, 1)

    # sigmoid; the divide goes to the EUP reciprocal (approx), exp already on EUP.
    out_ref[...] = pl.reciprocal(1.0 + jnp.exp(-logit), approx=True)


def nbow_forward(x, w1_t, b1, w2_t, b2):
    """Forward pass of NbowModel.

    x:    (B, VOCAB) f32 bag-of-words counts
    w1_t: (VOCAB, HID) f32   dense1 weight (transposed vs torch's (out, in))
    b1:   (HID,)  f32
    w2_t: (HID, OUT) f32     dense2 weight (transposed vs torch)
    b2:   (OUT,)  f32
    Returns (probs (B, 1) f32, l1_penalty scalar, l2_penalty scalar).
    """
    B = x.shape[0]
    assert B % TB == 0, "batch must be a multiple of the row tile"

    # Penalties depend only on dense1.weight -> hoisted off the per-batch hot
    # path, computed exactly in f32 plain JAX.
    l1 = L1_COEF * jnp.sum(jnp.abs(w1_t))
    l2 = L2_COEF * jnp.sqrt(jnp.sum(w1_t * w1_t))

    # Lane-pad the tiny hidden dim; bf16 for the MXU operands (halves DMA).
    w1_p = jnp.zeros((VOCAB, HID_PAD), jnp.bfloat16).at[:, :HID].set(
        w1_t.astype(jnp.bfloat16))
    b1_p = jnp.zeros((1, HID_PAD), jnp.float32).at[0, :HID].set(b1)
    w2_row = jnp.zeros((1, HID_PAD), jnp.float32).at[0, :HID].set(w2_t[:, 0])
    b2_s = b2.reshape(1, 1).astype(jnp.float32)
    x_bf16 = x.astype(jnp.bfloat16)

    probs = pl.pallas_call(
        nbow_kernel,
        out_shape=jax.ShapeDtypeStruct((B, OUT), jnp.float32),
        grid=(B // TB,),
        in_specs=[
            pl.BlockSpec((TB, VOCAB), lambda i: (i, 0)),           # x row tile
            pl.BlockSpec((VOCAB, HID_PAD), lambda i: (0, 0)),      # w1 (resident)
            pl.BlockSpec((1, HID_PAD), lambda i: (0, 0)),          # b1 (resident)
            pl.BlockSpec((1, HID_PAD), lambda i: (0, 0)),          # w2 row (resident)
            pl.BlockSpec((1, 1), lambda i: (0, 0),
                         memory_space=pltpu.MemorySpace.SMEM),     # b2 scalar
        ],
        out_specs=pl.BlockSpec((TB, OUT), lambda i: (i, 0)),
        compiler_params=pltpu.CompilerParams(
            dimension_semantics=("parallel",)),                    # 2 TCs on v7x
    )(x_bf16, w1_p, b1_p, w2_row, b2_s)

    return probs, l1, l2


if __name__ == "__main__":
    key = jax.random.PRNGKey(0)
    kx, k1, k2, k3, k4 = jax.random.split(key, 5)

    # Bag-of-words counts: small non-negative integers (exact in bf16).
    x = jnp.floor(jax.random.uniform(kx, (BATCH, VOCAB), jnp.float32, 0.0, 4.0))

    # torch.nn.Linear default init: uniform(+-1/sqrt(fan_in)); stored as (in, out).
    bound1 = 1.0 / jnp.sqrt(VOCAB)
    bound2 = 1.0 / jnp.sqrt(HID)
    w1_t = jax.random.uniform(k1, (VOCAB, HID), jnp.float32, -bound1, bound1)
    b1 = jax.random.uniform(k2, (HID,), jnp.float32, -bound1, bound1)
    w2_t = jax.random.uniform(k3, (HID, OUT), jnp.float32, -bound2, bound2)
    b2 = jax.random.uniform(k4, (OUT,), jnp.float32, -bound2, bound2)

    probs, l1_pen, l2_pen = jax.jit(nbow_forward)(x, w1_t, b1, w2_t, b2)
    jax.block_until_ready((probs, l1_pen, l2_pen))

    # Pure-JAX f32 reference.
    h_ref = jnp.maximum(x @ w1_t + b1, 0.0)
    probs_ref = jax.nn.sigmoid(h_ref @ w2_t + b2)
    l1_ref = L1_COEF * jnp.sum(jnp.abs(w1_t))
    l2_ref = L2_COEF * jnp.sqrt(jnp.sum(w1_t * w1_t))

    assert probs.shape == (BATCH, OUT)
    assert jnp.max(jnp.abs(probs - probs_ref)) < 2e-2, "probs mismatch"   # bf16 matmul tol
    assert jnp.allclose(l1_pen, l1_ref, atol=1e-6), "l1 mismatch"
    assert jnp.allclose(l2_pen, l2_ref, atol=1e-6), "l2 mismatch"

    print("KERNEL_OK")
</pallas_src>

<mosaic_0001>
module attributes {stable_mosaic.version = 11 : i64} {
  func.func @nbow_kernel(%arg0: i32, %arg1: memref<128x128xbf16, #tpu.memory_space<vmem>>, %arg2: memref<128x128xbf16, #tpu.memory_space<vmem>>, %arg3: memref<1x128xf32, #tpu.memory_space<vmem>>, %arg4: memref<1x128xf32, #tpu.memory_space<vmem>>, %arg5: memref<1x1xf32, #tpu.memory_space<smem>>, %arg6: memref<128x1xf32, #tpu.memory_space<vmem>>) attributes {dimension_semantics = [#tpu.dimension_semantics<parallel>], iteration_bounds = array<i64: 2>, scalar_prefetch = 0 : i64, scratch_operands = 0 : i64, tpu.core_type = #tpu.core_type<tc>, window_params = [{transform_indices = @transform_0, window_bounds = array<i64: 128, 128>}, {pipeline_mode = #tpu.pipeline_mode<synchronous>, transform_indices = @transform_1, window_bounds = array<i64: 128, 128>}, {pipeline_mode = #tpu.pipeline_mode<synchronous>, transform_indices = @transform_2, window_bounds = array<i64: 1, 128>}, {pipeline_mode = #tpu.pipeline_mode<synchronous>, transform_indices = @transform_3, window_bounds = array<i64: 1, 128>}, {transform_indices = @transform_4, window_bounds = array<i64: 1, 1>}, {transform_indices = @transform_5, window_bounds = array<i64: 128, 1>}]} {
    %c0 = arith.constant 0 : index
    %c0_0 = arith.constant 0 : index
    %0 = vector.load %arg1[%c0, %c0_0] : memref<128x128xbf16, #tpu.memory_space<vmem>>, vector<128x128xbf16>
    %c0_1 = arith.constant 0 : index
    %c0_2 = arith.constant 0 : index
    %1 = vector.load %arg2[%c0_1, %c0_2] : memref<128x128xbf16, #tpu.memory_space<vmem>>, vector<128x128xbf16>
    %cst = arith.constant dense<0.000000e+00> : vector<128x128xf32>
    %2 = tpu.matmul %0, %1, %cst {dimension_numbers = #tpu.dot_dimension_numbers<[1], [0], [0], [1], [0, 0, 1, 1], [], []>} : vector<128x128xbf16>, vector<128x128xbf16>, vector<128x128xf32> -> vector<128x128xf32>
    %c0_3 = arith.constant 0 : index
    %c0_4 = arith.constant 0 : index
    %3 = vector.load %arg3[%c0_3, %c0_4] : memref<1x128xf32, #tpu.memory_space<vmem>>, vector<1x128xf32>
    %4 = vector.broadcast %3 : vector<1x128xf32> to vector<128x128xf32>
    %5 = arith.addf %2, %4 : vector<128x128xf32>
    %cst_5 = arith.constant 0.000000e+00 : f32
    %6 = vector.broadcast %cst_5 : f32 to vector<128x128xf32>
    %7 = arith.maximumf %5, %6 : vector<128x128xf32>
    %c0_6 = arith.constant 0 : index
    %c0_7 = arith.constant 0 : index
    %8 = vector.load %arg4[%c0_6, %c0_7] : memref<1x128xf32, #tpu.memory_space<vmem>>, vector<1x128xf32>
    %9 = vector.broadcast %8 : vector<1x128xf32> to vector<128x128xf32>
    %10 = arith.mulf %7, %9 : vector<128x128xf32>
    %cst_8 = arith.constant dense<0.000000e+00> : vector<128xf32>
    %11 = vector.multi_reduction <add>, %10, %cst_8 [1] : vector<128x128xf32> to vector<128xf32>
    %12 = vector.shape_cast %11 : vector<128xf32> to vector<128x1xf32>
    %c0_9 = arith.constant 0 : index
    %c0_10 = arith.constant 0 : index
    %13 = memref.load %arg5[%c0_9, %c0_10] : memref<1x1xf32, #tpu.memory_space<smem>>
    %14 = vector.broadcast %13 : f32 to vector<128x1xf32>
    %15 = arith.addf %12, %14 : vector<128x1xf32>
    %cst_11 = arith.constant 0.000000e+00 : f32
    %16 = vector.broadcast %cst_11 : f32 to vector<128x1xf32>
    %17 = arith.subf %16, %15 : vector<128x1xf32>
    %18 = math.exp %17 : vector<128x1xf32>
    %cst_12 = arith.constant 1.000000e+00 : f32
    %19 = vector.broadcast %cst_12 : f32 to vector<128x1xf32>
    %20 = arith.addf %19, %18 : vector<128x1xf32>
    %21 = tpu.reciprocal %20 {approx = true} : vector<128x1xf32> -> vector<128x1xf32>
    %c0_13 = arith.constant 0 : index
    %c0_14 = arith.constant 0 : index
    %22 = vector.load %arg6[%c0_13, %c0_14] : memref<128x1xf32, #tpu.memory_space<vmem>>, vector<128x1xf32>
    tpu.vector_store %arg6[%c0_13, %c0_14], %21 {strides = array<i32>} : memref<128x1xf32, #tpu.memory_space<vmem>>, vector<128x1xf32>,
    return
  }
  func.func @transform_0(%arg0: i32) -> (i32, i32) {
    %c0_i32 = arith.constant 0 : i32
    %c0_i32_0 = arith.constant 0 : i32
    return %arg0, %c0_i32 : i32, i32
  }
  func.func @transform_1(%arg0: i32) -> (i32, i32) {
    %c0_i32 = arith.constant 0 : i32
    %c0_i32_0 = arith.constant 0 : i32
    %c0_i32_1 = arith.constant 0 : i32
    return %c0_i32, %c0_i32_0 : i32, i32
  }
  func.func @transform_2(%arg0: i32) -> (i32, i32) {
    %c0_i32 = arith.constant 0 : i32
    %c0_i32_0 = arith.constant 0 : i32
    %c0_i32_1 = arith.constant 0 : i32
    return %c0_i32, %c0_i32_0 : i32, i32
  }
  func.func @transform_3(%arg0: i32) -> (i32, i32) {
    %c0_i32 = arith.constant 0 : i32
    %c0_i32_0 = arith.constant 0 : i32
    %c0_i32_1 = arith.constant 0 : i32
    return %c0_i32, %c0_i32_0 : i32, i32
  }
  func.func @transform_4(%arg0: i32) -> (i32, i32) {
    %c0_i32 = arith.constant 0 : i32
    %c0_i32_0 = arith.constant 0 : i32
    %c0_i32_1 = arith.constant 0 : i32
    return %c0_i32, %c0_i32_0 : i32, i32
  }
  func.func @transform_5(%arg0: i32) -> (i32, i32) {
    %c0_i32 = arith.constant 0 : i32
    %c0_i32_0 = arith.constant 0 : i32
    return %arg0, %c0_i32 : i32, i32
  }
}

</mosaic_0001>

<bundles_post_ra>
// kernel: nbow_forward.1
= control target key start
LH: loop header
LB: loop body
LE: loop exit
PB: predicated region body
PF: predicated region fallthrough
CT: control target
= control target key end

     0   :  { %s926_s20 = smov 0   ;;  %s1075_s0 = inlined_call_operand.vmem [shape: bf16[256,128], index: 0, kind: input, shape index: {}]   ;;  %s1076_s1 = inlined_call_operand.vmem [shape: bf16[128,128], index: 1, kind: input, shape index: {}]   ;;  %s1077_s2 = inlined_call_operand.vmem [shape: f32[1,128], index: 2, kind: input, shape index: {}]   ;;  %s1078_s3 = inlined_call_operand.vmem [shape: f32[1,128], index: 3, kind: input, shape index: {}]   ;;  %s1079_s4 = inlined_call_operand.<no memory space> [shape: f32[1,1], index: 4, kind: input, shape index: {}]   ;;  %s1080_s5 = inlined_call_operand.vmem [shape: f32[256,1], index: 5, kind: output, shape index: {}]  }
   0x1   :  { %10 = sst [smem:[#allocation2]] %s1079_s4 }
   0x2 LB: > { %s704_s21 = sadd.s32 4294967295, %s891_s20   ;;  %p708_p0 = scmp.ge.s32.totalorder %s891_s20, 1  ;;  %s891_s20 = sphi %s926_s20, %s16_s20  }
   0x3   : > { %p189_p1 = scmp.lt.s32.totalorder %s891_s20, 3 }
   0x5   : > { %p190_p2 = pnand %p708_p0, %p189_p1 }
   0x6   : > { %v805_v0 = vld [vmem:[%s1076_s1] sm:$0xff] (!%p190_p2)   ;;  %s709_s4 = sshll.u32 (!%p190_p2), %s704_s21, 4  ;;  %v806_v1 = vld [vmem:[%s1076_s1 + $0x8] sm:$0xff] (!%p190_p2)   ;;  %v807_v2 = vld [vmem:[%s1076_s1 + $0x10] sm:$0xff] (!%p190_p2)   ;;  %s533_s22 = sld [smem:[#allocation2]] (!%p190_p2)  ;;  %vm631_vm0 = vcmask (!%p190_p2), 7168  }
   0x7   : > { %193 = sbr.rel (%p190_p2) target bundleno = 461 (0x1cd), region = 40  ;;  %p218_p3 = scmp.lt.s32.totalorder (!%p190_p2), %s709_s4, 31  ;;  %749 = vmatprep.subr.bf16.mxu0 (!%p190_p2), %v805_v0  ;;  %781 = vmatprep.subr.bf16.mxu1 (!%p190_p2), %v805_v0  ;;  %v808_v3 = vld [vmem:[%s1076_s1 + $0x18] sm:$0xff] (!%p190_p2)   ;;  %v809_v6 = vld [vmem:[%s1076_s1 + $0x20] sm:$0xff] (!%p190_p2)   ;;  %v810_v7 = vld [vmem:[%s1076_s1 + $0x28] sm:$0xff] (!%p190_p2)  }
   0x8   : > { %750 = vmatpush3.bf16.msra.mxu0 (!%p190_p2), %v805_v0  ;;  %789 = vmatpush3.bf16.msra.mxu1 (!%p190_p2), %v805_v0  ;;  %v811_v8 = vld [vmem:[%s1076_s1 + $0x30] sm:$0xff] (!%p190_p2)   ;;  %v812_v9 = vld [vmem:[%s1076_s1 + $0x38] sm:$0xff] (!%p190_p2)   ;;  %v977_v16 = vld [vmem:[%s1077_s2] ss:$0 sm:$0xff] (!%p190_p2) }
   0x9   : > { %751 = vmatprep.subr.bf16.mxu0 (!%p190_p2), %v806_v1  ;;  %782 = vmatprep.subr.bf16.mxu1 (!%p190_p2), %v806_v1  ;;  %v985_v26 = vld [vmem:[%s1078_s3] ss:$0 sm:$0xff] (!%p190_p2) }
   0xc   : > { %752 = vmatpush3.bf16.msra.mxu0 (!%p190_p2), %v806_v1  ;;  %790 = vmatpush3.bf16.msra.mxu1 (!%p190_p2), %v806_v1 }
   0xd   : > { %753 = vmatprep.subr.bf16.mxu0 (!%p190_p2), %v807_v2  ;;  %783 = vmatprep.subr.bf16.mxu1 (!%p190_p2), %v807_v2 }
   0xe   : > { %s1082_s4 = smov (!%p218_p3, %s709_s4), 31 }
   0xf   : > { %s710_s28 = sshll.u32 %s1082_s4, 2  ;;  %s712_s23 = sshll.u32 %s1082_s4, 3 }
  0x10   : > { %s949_s6 = scalar_lea.vmem %s1075_s0, %s710_s28  ;;  %754 = vmatpush3.bf16.msra.mxu0 %v807_v2  ;;  %791 = vmatpush3.bf16.msra.mxu1 %v807_v2  ;;  %s1036_s26 = scalar_lea.vmem %s1080_s5, %s712_s23 }
  0x11   : > { %v813_v4 = vld [vmem:[%s949_s6] sm:$0xff]   ;;  %755 = vmatprep.subr.bf16.mxu0 %v808_v3  ;;  %784 = vmatprep.subr.bf16.mxu1 %v808_v3  ;;  %v815_v10 = vld [vmem:[%s949_s6 + $0x8] sm:$0xff]   ;;  %v817_v12 = vld [vmem:[%s949_s6 + $0x10] sm:$0xff]  }
  0x12   : > { %v814_v5 = vld [vmem:[%s949_s6 + $0x20] sm:$0xff]   ;;  %765 = vmatprep.mubr.bf16.mxu0 %v813_v4  ;;  %v816_v11 = vld [vmem:[%s949_s6 + $0x28] sm:$0xff]   ;;  %v819_v13 = vld [vmem:[%s949_s6 + $0x30] sm:$0xff]  }
  0x13   : > { %773 = vmatprep.mubr.bf16.mxu1 %v814_v5  ;;  %v818_v14 = vld [vmem:[%s949_s6 + $0x18] sm:$0xff]  }
  0x14   : > { %756 = vmatpush3.bf16.msra.mxu0 %v808_v3  ;;  %792 = vmatpush3.bf16.msra.mxu1 %v808_v3  ;;  %v820_v15 = vld [vmem:[%s949_s6 + $0x38] sm:$0xff]  }
  0x15   : > { %757 = vmatprep.subr.bf16.mxu0 %v809_v6  ;;  %785 = vmatprep.subr.bf16.mxu1 %v809_v6 }
  0x18   : > { %758 = vmatpush3.bf16.msra.mxu0 %v809_v6  ;;  %793 = vmatpush3.bf16.msra.mxu1 %v809_v6 }
  0x19   : > { %759 = vmatprep.subr.bf16.mxu0 %v810_v7  ;;  %786 = vmatprep.subr.bf16.mxu1 %v810_v7 }
  0x1c   : > { %760 = vmatpush3.bf16.msra.mxu0 %v810_v7  ;;  %794 = vmatpush3.bf16.msra.mxu1 %v810_v7 }
  0x1d   : > { %761 = vmatprep.subr.bf16.mxu0 %v811_v8  ;;  %787 = vmatprep.subr.bf16.mxu1 %v811_v8 }
  0x20   : > { %762 = vmatpush3.bf16.msra.mxu0 %v811_v8  ;;  %795 = vmatpush3.bf16.msra.mxu1 %v811_v8 }
  0x21   : > { %763 = vmatprep.subr.bf16.mxu0 %v812_v9  ;;  %788 = vmatprep.subr.bf16.mxu1 %v812_v9 }
  0x24   : > { %764 = vmatpush3.bf16.msra.mxu0 %v812_v9  ;;  %796 = vmatpush3.bf16.msra.mxu1 %v812_v9 }
  0x27   : > { %766 = vmatmul.mubr.bf16.vlgmr.msra.gmra.mrb[0].mxu0 %v815_v10  ;;  %774 = vmatmul.mubr.bf16.vlgmr.msra.gmra.mrb[0].mxu1 %v816_v11 }
  0x28   : > { %769 = vmatprep.mubr.bf16.mxu0 %v817_v12  ;;  %777 = vmatprep.mubr.bf16.mxu1 %v819_v13 }
  0x2f   : > { %770 = vmatmul.mubr.bf16.gmra.mrb[4].mxu0 %v818_v14  ;;  %778 = vmatmul.mubr.bf16.gmra.mrb[4].mxu1 %v820_v15 }
  0xfa   : > { %v767_v17 = vpop.f32.mrb[0].mxu0  ;;  %v775_v18 = vpop.f32.mrb[0].mxu1 }
  0xfb   : > { %v408_v19 = vadd.f32 %v767_v17, %v977_v16  ;;  %v440_v20 = vadd.f32 %v775_v18, %v977_v16  ;;  %v399_v21 = vpop.f32.mrb[1].mxu0  ;;  %v431_v22 = vpop.f32.mrb[1].mxu1  ;;  %v1016_v18 = vstv %s533_s22 }
  0xfc   : > { %v400_v23 = vadd.f32 %v977_v16, %v399_v21  ;;  %v768_v24 = vpop.f32.mrb[2].mxu0  ;;  %v776_v25 = vpop.f32.mrb[2].mxu1  ;;  %v432_v32 = vadd.f32 %v977_v16, %v431_v22 }
  0xfd   : > { %v464_v27 = vmax.f32 %v408_v19, 0.0  ;;  %v472_v28 = vmax.f32 %v440_v20, 0.0  ;;  %v411_v29 = vadd.f32 %v768_v24, %v977_v16  ;;  %v402_v30 = vpop.f32.mrb[3].mxu0  ;;  %v434_v31 = vpop.f32.mrb[3].mxu1  ;;  %v443_v33 = vadd.f32 %v776_v25, %v977_v16 }
  0xfe   : > { %v462_v34 = vmax.f32 %v400_v23, 0.0  ;;  %v403_v38 = vadd.f32 %v977_v16, %v402_v30  ;;  %v435_v39 = vadd.f32 %v977_v16, %v434_v31  ;;  %v470_v42 = vmax.f32 %v432_v32, 0.0 }
  0xff   : > { %v465_v35 = vmax.f32 %v411_v29, 0.0  ;;  %v495_v36 = vmul.f32 %v985_v26, %v472_v28  ;;  %v487_v37 = vmul.f32 %v985_v26, %v464_v27  ;;  %v473_v43 = vmax.f32 %v443_v33, 0.0 }
 0x100   : > { %v485_v45 = vmul.f32 %v985_v26, %v462_v34  ;;  %v463_v52 = vmax.f32 %v403_v38, 0.0  ;;  %v471_v53 = vmax.f32 %v435_v39, 0.0  ;;  %v493_v57 = vmul.f32 %v985_v26, %v470_v42 }
 0x101   : > { %521 = vadd.xlane.f32.xlu0 %v495_v36  ;;  %505 = vadd.xlane.f32.xlu1 %v487_v37  ;;  %v488_v44 = vmul.f32 %v985_v26, %v465_v35  ;;  %v496_v56 = vmul.f32 %v985_v26, %v473_v43 }
 0x102   : > { %v771_v40 = vpop.f32.mrb[4].mxu0  ;;  %v779_v41 = vpop.f32.mrb[4].mxu1  ;;  %v494_v59 = vmul.f32 %v985_v26, %v471_v53  ;;  %v486_v63 = vmul.f32 %v985_v26, %v463_v52 }
 0x103   : > { %v415_v46 = vpop.f32.mrb[5].mxu0  ;;  %v447_v47 = vpop.f32.mrb[5].mxu1  ;;  %v424_v54 = vadd.f32 %v771_v40, %v977_v16  ;;  %v456_v6 = vadd.f32 %v779_v41, %v977_v16 }
 0x104   : > { %v772_v48 = vpop.f32.mrb[6].mxu0  ;;  %v780_v49 = vpop.f32.mrb[6].mxu1  ;;  %v416_v58 = vadd.f32 %v977_v16, %v415_v46  ;;  %v448_v1 = vadd.f32 %v977_v16, %v447_v47 }
 0x105   : > { %507 = vadd.xlane.f32.xlu1 %v488_v44  ;;  %501 = vadd.xlane.f32.xlu0 %v485_v45  ;;  %v418_v50 = vpop.f32.mrb[7].mxu0  ;;  %v450_v51 = vpop.f32.mrb[7].mxu1  ;;  %v427_v55 = vadd.f32 %v772_v48, %v977_v16  ;;  %v468_v60 = vmax.f32 %v424_v54, 0.0  ;;  %v459_v7 = vadd.f32 %v780_v49, %v977_v16  ;;  %v476_v12 = vmax.f32 %v456_v6, 0.0 }
 0x106   : > { %v419_v62 = vadd.f32 %v977_v16, %v418_v50  ;;  %v466_v0 = vmax.f32 %v416_v58, 0.0  ;;  %v451_v3 = vadd.f32 %v977_v16, %v450_v51  ;;  %v474_v8 = vmax.f32 %v448_v1, 0.0 }
 0x107   : > { %v469_v61 = vmax.f32 %v427_v55, 0.0  ;;  %v491_v5 = vmul.f32 %v985_v26, %v468_v60  ;;  %v477_v13 = vmax.f32 %v459_v7, 0.0  ;;  %v499_v16 = vmul.f32 %v985_v26, %v476_v12 }
 0x108   : > { %v467_v2 = vmax.f32 %v419_v62, 0.0  ;;  %v475_v9 = vmax.f32 %v451_v3, 0.0  ;;  %v489_v11 = vmul.f32 %v985_v26, %v466_v0  ;;  %v497_v15 = vmul.f32 %v985_v26, %v474_v8 }
 0x109   : > { %523 = vadd.xlane.f32.xlu1 %v496_v56  ;;  %517 = vadd.xlane.f32.xlu0 %v493_v57  ;;  %v492_v4 = vmul.f32 %v985_v26, %v469_v61  ;;  %v500_v17 = vmul.f32 %v985_v26, %v477_v13 }
 0x10a   : > { %v490_v10 = vmul.f32 %v985_v26, %v467_v2  ;;  %v498_v14 = vmul.f32 %v985_v26, %v475_v9 }
 0x10d   : > { %519 = vadd.xlane.f32.xlu1 %v494_v59  ;;  %503 = vadd.xlane.f32.xlu0 %v486_v63 }
 0x111   : > { %515 = vadd.xlane.f32.xlu1 %v492_v4  ;;  %513 = vadd.xlane.f32.xlu0 %v491_v5 }
 0x115   : > { %511 = vadd.xlane.f32.xlu1 %v490_v10  ;;  %509 = vadd.xlane.f32.xlu0 %v489_v11 }
 0x119   : > { %527 = vadd.xlane.f32.xlu1 %v498_v14  ;;  %525 = vadd.xlane.f32.xlu0 %v497_v15 }
 0x11d   : > { %531 = vadd.xlane.f32.xlu1 %v500_v17  ;;  %529 = vadd.xlane.f32.xlu0 %v499_v16 }
 0x18e   : > { %v522_v19 = vpop.xlane.xlu0 %521  ;;  %v506_v20 = vpop.xlane.xlu1 %505 }
 0x18f   : > { %v545_v21 = vadd.f32 %v1016_v18, %v522_v19  ;;  %v537_v22 = vadd.f32 %v1016_v18, %v506_v20 }
 0x191   : > { %v561_v23 = vsub.f32 0.0, %v545_v21  ;;  %v553_v24 = vsub.f32 0.0, %v537_v22 }
 0x192   : > { %v508_v25 = vpop.xlane.xlu1 %507  ;;  %v502_v27 = vpop.xlane.xlu0 %501 }
 0x193   : > { %v587_v28 = vmul.f32 1.442695, %v561_v23  ;;  %v571_v29 = vmul.f32 1.442695, %v553_v24  ;;  %v538_v30 = vadd.f32 %v1016_v18, %v508_v25  ;;  %v535_v26 = vadd.f32 %v1016_v18, %v502_v27 }
 0x195   : > { %821 = vpow2.f32 %v587_v28  ;;  %v554_v31 = vsub.f32 0.0, %v538_v30  ;;  %v551_v32 = vsub.f32 0.0, %v535_v26 }
 0x196   : > { %823 = vpow2.f32 %v571_v29  ;;  %v524_v33 = vpop.xlane.xlu1 %523  ;;  %v518_v34 = vpop.xlane.xlu0 %517 }
 0x197   : > { %v573_v35 = vmul.f32 1.442695, %v554_v31  ;;  %v567_v36 = vmul.f32 1.442695, %v551_v32  ;;  %v546_v37 = vadd.f32 %v1016_v18, %v524_v33  ;;  %v543_v38 = vadd.f32 %v1016_v18, %v518_v34 }
 0x199   : > { %825 = vpow2.f32 %v573_v35  ;;  %v562_v39 = vsub.f32 0.0, %v546_v37  ;;  %v559_v40 = vsub.f32 0.0, %v543_v38 }
 0x19a   : > { %827 = vpow2.f32 %v567_v36  ;;  %v520_v41 = vpop.xlane.xlu1 %519  ;;  %v504_v42 = vpop.xlane.xlu0 %503 }
 0x19b   : > { %v589_v43 = vmul.f32 1.442695, %v562_v39  ;;  %v583_v44 = vmul.f32 1.442695, %v559_v40  ;;  %v544_v45 = vadd.f32 %v1016_v18, %v520_v41  ;;  %v536_v46 = vadd.f32 %v1016_v18, %v504_v42 }
 0x19d   : > { %829 = vpow2.f32 %v589_v43  ;;  %v560_v47 = vsub.f32 0.0, %v544_v45  ;;  %v552_v48 = vsub.f32 0.0, %v536_v46 }
 0x19e   : > { %831 = vpow2.f32 %v583_v44  ;;  %v516_v49 = vpop.xlane.xlu1 %515  ;;  %v514_v50 = vpop.xlane.xlu0 %513 }
 0x19f   : > { %v822_v51 = vpop.eup %821  ;;  %v585_v52 = vmul.f32 1.442695, %v560_v47  ;;  %v542_v53 = vadd.f32 %v1016_v18, %v516_v49  ;;  %v541_v54 = vadd.f32 %v1016_v18, %v514_v50  ;;  %v569_v57 = vmul.f32 1.442695, %v552_v48 }
 0x1a0   : > { %v824_v55 = vpop.eup %823  ;;  %v609_v56 = vadd.f32 1.0, %v822_v51 }
 0x1a1   : > { %v601_v58 = vadd.f32 1.0, %v824_v55  ;;  %833 = vpow2.f32 %v585_v52  ;;  %v558_v59 = vsub.f32 0.0, %v542_v53  ;;  %v557_v60 = vsub.f32 0.0, %v541_v54 }
 0x1a2   : > { %835 = vrcp.f32 %v609_v56  ;;  %v512_v61 = vpop.xlane.xlu1 %511  ;;  %v510_v62 = vpop.xlane.xlu0 %509 }
 0x1a3   : > { %v826_v63 = vpop.eup %825  ;;  %837 = vrcp.f32 %v601_v58  ;;  %v581_v0 = vmul.f32 1.442695, %v558_v59  ;;  %v540_v1 = vadd.f32 %v1016_v18, %v512_v61  ;;  %v579_v4 = vmul.f32 1.442695, %v557_v60 }
 0x1a4   : > { %v828_v2 = vpop.eup %827  ;;  %v602_v3 = vadd.f32 1.0, %v826_v63  ;;  %839 = vpow2.f32 %v569_v57  ;;  %v539_v5 = vadd.f32 %v1016_v18, %v510_v62 }
 0x1a5   : > { %v599_v6 = vadd.f32 1.0, %v828_v2  ;;  %841 = vpow2.f32 %v581_v0  ;;  %v556_v7 = vsub.f32 0.0, %v540_v1 }
 0x1a6   : > { %843 = vrcp.f32 %v602_v3  ;;  %v555_v8 = vsub.f32 0.0, %v539_v5  ;;  %v528_v9 = vpop.xlane.xlu1 %527  ;;  %v526_v10 = vpop.xlane.xlu0 %525 }
 0x1a7   : > { %v830_v11 = vpop.eup %829  ;;  %845 = vrcp.f32 %v599_v6  ;;  %v577_v12 = vmul.f32 1.442695, %v556_v7  ;;  %v548_v13 = vadd.f32 %v1016_v18, %v528_v9  ;;  %v547_v14 = vadd.f32 %v1016_v18, %v526_v10 }
 0x1a8   : > { %v832_v15 = vpop.eup %831  ;;  %v610_v17 = vadd.f32 1.0, %v830_v11  ;;  %847 = vpow2.f32 %v579_v4  ;;  %v575_v16 = vmul.f32 1.442695, %v555_v8 }
 0x1a9   : > { %v607_v19 = vadd.f32 1.0, %v832_v15  ;;  %849 = vpow2.f32 %v577_v12  ;;  %v564_v20 = vsub.f32 0.0, %v548_v13  ;;  %v563_v21 = vsub.f32 0.0, %v547_v14 }
 0x1aa   : > { %851 = vrcp.f32 %v610_v17  ;;  %v532_v22 = vpop.xlane.xlu1 %531  ;;  %v530_v23 = vpop.xlane.xlu0 %529 }
 0x1ab   : > { %v834_v24 = vpop.eup %833  ;;  %853 = vrcp.f32 %v607_v19  ;;  %v593_v25 = vmul.f32 1.442695, %v564_v20  ;;  %v591_v27 = vmul.f32 1.442695, %v563_v21  ;;  %v550_v28 = vadd.f32 %v1016_v18, %v532_v22 }
 0x1ac   : > { %v836_v29 = vpop.eup %835  ;;  %v608_v30 = vadd.f32 1.0, %v834_v24  ;;  %855 = vpow2.f32 %v575_v16  ;;  %v549_v26 = vadd.f32 %v1016_v18, %v530_v23 }
 0x1ad   : > { %v838_v31 = vpop.eup %837  ;;  %642 = vst.msk [vmem:[%s1036_s26 + $0x50] sm:$0xff] %vm631_vm0, %v836_v29  ;;  %857 = vpow2.f32 %v593_v25  ;;  %v566_v32 = vsub.f32 0.0, %v550_v28 }
 0x1ae   : > { %v840_v33 = vpop.eup %839  ;;  %634 = vst.msk [vmem:[%s1036_s26 + $0x10] sm:$0xff] %vm631_vm0, %v838_v31  ;;  %859 = vrcp.f32 %v608_v30  ;;  %v565_v34 = vsub.f32 0.0, %v549_v26 }
 0x1af   : > { %v842_v35 = vpop.eup %841  ;;  %v600_v36 = vadd.f32 1.0, %v840_v33  ;;  %861 = vpow2.f32 %v591_v27  ;;  %v597_v37 = vmul.f32 1.442695, %v566_v32 }
 0x1b0   : > { %v844_v38 = vpop.eup %843  ;;  %v606_v39 = vadd.f32 1.0, %v842_v35  ;;  %v595_v18 = vmul.f32 1.442695, %v565_v34 }
 0x1b1   : > { %v846_v40 = vpop.eup %845  ;;  %635 = vst.msk [vmem:[%s1036_s26 + $0x18] sm:$0xff] %vm631_vm0, %v844_v38  ;;  %863 = vrcp.f32 %v600_v36 }
 0x1b2   : > { %v848_v41 = vpop.eup %847  ;;  %632 = vst.msk [vmem:[%s1036_s26] sm:$0xff] %vm631_vm0, %v846_v40  ;;  %865 = vrcp.f32 %v606_v39 }
 0x1b3   : > { %v850_v42 = vpop.eup %849  ;;  %v605_v43 = vadd.f32 1.0, %v848_v41  ;;  %867 = vpow2.f32 %v597_v37 }
 0x1b4   : > { %v852_v44 = vpop.eup %851  ;;  %v604_v45 = vadd.f32 1.0, %v850_v42  ;;  %869 = vpow2.f32 %v595_v18 }
 0x1b5   : > { %v854_v46 = vpop.eup %853  ;;  %643 = vst.msk [vmem:[%s1036_s26 + $0x58] sm:$0xff] %vm631_vm0, %v852_v44  ;;  %871 = vrcp.f32 %v605_v43 }
 0x1b6   : > { %v856_v47 = vpop.eup %855  ;;  %640 = vst.msk [vmem:[%s1036_s26 + $0x40] sm:$0xff] %vm631_vm0, %v854_v46  ;;  %873 = vrcp.f32 %v604_v45 }
 0x1b7   : > { %v858_v48 = vpop.eup %857  ;;  %v603_v49 = vadd.f32 1.0, %v856_v47 }
 0x1b8   : > { %v860_v50 = vpop.eup %859  ;;  %v612_v51 = vadd.f32 1.0, %v858_v48 }
 0x1b9   : > { %v862_v52 = vpop.eup %861  ;;  %641 = vst.msk [vmem:[%s1036_s26 + $0x48] sm:$0xff] %vm631_vm0, %v860_v50  ;;  %875 = vrcp.f32 %v603_v49 }
 0x1ba   : > { %877 = vrcp.f32 %v612_v51  ;;  %v611_v53 = vadd.f32 1.0, %v862_v52 }
 0x1bb   : > { %v864_v54 = vpop.eup %863 }
 0x1bc   : > { %v866_v55 = vpop.eup %865  ;;  %633 = vst.msk [vmem:[%s1036_s26 + $0x8] sm:$0xff] %vm631_vm0, %v864_v54  ;;  %879 = vrcp.f32 %v611_v53 }
 0x1bd   : > { %v868_v56 = vpop.eup %867  ;;  %639 = vst.msk [vmem:[%s1036_s26 + $0x38] sm:$0xff] %vm631_vm0, %v866_v55 }
 0x1be   : > { %v870_v57 = vpop.eup %869  ;;  %v614_v58 = vadd.f32 1.0, %v868_v56 }
 0x1bf   : > { %v872_v59 = vpop.eup %871  ;;  %v613_v60 = vadd.f32 1.0, %v870_v57 }
 0x1c0   : > { %v874_v61 = vpop.eup %873  ;;  %638 = vst.msk [vmem:[%s1036_s26 + $0x30] sm:$0xff] %vm631_vm0, %v872_v59  ;;  %881 = vrcp.f32 %v614_v58 }
 0x1c1   : > { %637 = vst.msk [vmem:[%s1036_s26 + $0x28] sm:$0xff] %vm631_vm0, %v874_v61  ;;  %883 = vrcp.f32 %v613_v60 }
 0x1c3   : > { %v876_v62 = vpop.eup %875 }
 0x1c4   : > { %v878_v63 = vpop.eup %877  ;;  %636 = vst.msk [vmem:[%s1036_s26 + $0x20] sm:$0xff] %vm631_vm0, %v876_v62 }
 0x1c5   : > { %645 = vst.msk [vmem:[%s1036_s26 + $0x68] sm:$0xff] %vm631_vm0, %v878_v63 }
 0x1c6   : > { %v880_v0 = vpop.eup %879 }
 0x1c7   : > { %644 = vst.msk [vmem:[%s1036_s26 + $0x60] sm:$0xff] %vm631_vm0, %v880_v0 }
 0x1ca   : > { %v882_v1 = vpop.eup %881 }
 0x1cb   : > { %v884_v2 = vpop.eup %883  ;;  %647 = vst.msk [vmem:[%s1036_s26 + $0x78] sm:$0xff] %vm631_vm0, %v882_v1 }
 0x1cc   : > { %646 = vst.msk [vmem:[%s1036_s26 + $0x70] sm:$0xff] %vm631_vm0, %v884_v2 }
 0x1cd PF: > { %s16_s20 = sadd.s32 1, %s891_s20  }
 0x1ce   : > { %p13_p4 = scmp.ge.s32.totalorder %s16_s20, 4  }
 0x1d0   :  { %15 = sbr.rel (!%p13_p4) target bundleno = 2 (0x2), region = 70 }

</bundles_post_ra>
